<compile_context>
chip_gen: v7x
topology: tpu7x:2x2x1
jax: 0.10.0
libtpu: 0.0.40
codegen_flags: <defaults>
</compile_context>

<pallas_src>
import math
from collections import defaultdict

import numpy as np
import jax
import jax.numpy as jnp
from jax.experimental import pallas as pl
from jax.experimental.pallas import tpu as pltpu


# ---------------------------------------------------------------------------
# Pallas kernels (all single grid point, whole arrays resident in VMEM)
# ---------------------------------------------------------------------------

def gnn_kernel(a_in_ref, a_out_ref, h_ref,
               ein_wT, ein_b, eout_wT, eout_b,
               wih_in_rT, wih_in_zT, wih_in_nT,
               wih_out_rT, wih_out_zT, wih_out_nT,
               whh_rT, whh_zT, whh_nT,
               bih_r, bih_z, bih_n,
               bhh_r, bhh_z, bhh_n,
               b_iah, b_oah, out_ref):
    """One GNN cell over the whole (flattened) batch.

    h_ref: (B*N, H) item hidden, a_in/a_out: (B, N, N)."""
    f32 = jnp.float32
    B, N, _ = a_in_ref.shape
    h = h_ref[...]                                                  # (B*N, H)

    # Edge linears over the whole flattened batch (weights pre-transposed).
    h_in = jnp.dot(h, ein_wT[...], preferred_element_type=f32) + ein_b[...]
    h_out = jnp.dot(h, eout_wT[...], preferred_element_type=f32) + eout_b[...]

    # Per-batch adjacency matmuls (B is static -> unrolled, tiny).
    ins, outs = [], []
    for b in range(B):
        lo, hi = b * N, (b + 1) * N
        ins.append(jnp.dot(a_in_ref[b], h_in[lo:hi], preferred_element_type=f32))
        outs.append(jnp.dot(a_out_ref[b], h_out[lo:hi], preferred_element_type=f32))
    input_in = jnp.concatenate(ins, axis=0) + b_iah[...]            # (B*N, H)
    input_out = jnp.concatenate(outs, axis=0) + b_oah[...]          # (B*N, H)

    # Gate projections: weights are pre-split per gate (r, z, n) and
    # pre-transposed, so no lane-axis slicing of a (rows, 3H) tensor.
    gi_r = (jnp.dot(input_in, wih_in_rT[...], preferred_element_type=f32)
            + jnp.dot(input_out, wih_out_rT[...], preferred_element_type=f32)
            + bih_r[...])
    gi_z = (jnp.dot(input_in, wih_in_zT[...], preferred_element_type=f32)
            + jnp.dot(input_out, wih_out_zT[...], preferred_element_type=f32)
            + bih_z[...])
    gi_n = (jnp.dot(input_in, wih_in_nT[...], preferred_element_type=f32)
            + jnp.dot(input_out, wih_out_nT[...], preferred_element_type=f32)
            + bih_n[...])

    gh_r = jnp.dot(h, whh_rT[...], preferred_element_type=f32) + bhh_r[...]
    gh_z = jnp.dot(h, whh_zT[...], preferred_element_type=f32) + bhh_z[...]
    gh_n = jnp.dot(h, whh_nT[...], preferred_element_type=f32) + bhh_n[...]

    r = jax.nn.sigmoid(gi_r + gh_r)
    z = jax.nn.sigmoid(gi_z + gh_z)
    ng = jnp.tanh(gi_n + r * gh_n)
    out_ref[...] = ng + z * (h - ng)


def gru_kernel(x_ref, mask_ref,
               wih_rT, wih_zT, wih_nT,
               whh_rT, whh_zT, whh_nT,
               bih_r, bih_z, bih_n,
               bhh_r, bhh_z, bhh_n,
               out_ref, hfin_ref,
               gi_r_s, gi_z_s, gi_n_s):
    """Batched GRU over all sequences at once.

    x_ref/mask_ref/out_ref: (T*Mp, H) time-major flattened (row t*Mp + m).
    hfin_ref: (Mp, H) final hidden per sequence (pack_padded semantics via
    the mask). Input projection is hoisted out of the recurrence."""
    f32 = jnp.float32
    TM, H = x_ref.shape
    Mp, _ = hfin_ref.shape
    T = TM // Mp

    x = x_ref[...]                                                  # (T*Mp, H)
    # Hoisted input projection: one big matmul per gate, stored in VMEM scratch.
    gi_r_s[...] = jnp.dot(x, wih_rT[...], preferred_element_type=f32) + bih_r[...]
    gi_z_s[...] = jnp.dot(x, wih_zT[...], preferred_element_type=f32) + bih_z[...]
    gi_n_s[...] = jnp.dot(x, wih_nT[...], preferred_element_type=f32) + bih_n[...]

    h = jnp.zeros((Mp, H), f32)
    for t in range(T):                                              # static unroll
        lo, hi = t * Mp, (t + 1) * Mp
        gh_r = jnp.dot(h, whh_rT[...], preferred_element_type=f32) + bhh_r[...]
        gh_z = jnp.dot(h, whh_zT[...], preferred_element_type=f32) + bhh_z[...]
        gh_n = jnp.dot(h, whh_nT[...], preferred_element_type=f32) + bhh_n[...]
        r = jax.nn.sigmoid(gi_r_s[lo:hi, :] + gh_r)
        z = jax.nn.sigmoid(gi_z_s[lo:hi, :] + gh_z)
        n = jnp.tanh(gi_n_s[lo:hi, :] + r * gh_n)
        h_new = (1.0 - z) * n + z * h
        # pack_padded_sequence emulation: hidden only advances while t < length.
        m = mask_ref[lo:hi, :]
        h = m * h_new + (1.0 - m) * h
        out_ref[lo:hi, :] = h
    hfin_ref[...] = h


def hlinear_kernel(sh_ref, ao_ref, w1T, w2T, b_ref, out_ref):
    """cat([sh, ao], -1) @ W.T + b, then LeakyReLU(0.2), on a flat (B*T, H) slab."""
    f32 = jnp.float32
    y = (jnp.dot(sh_ref[...], w1T[...], preferred_element_type=f32)
         + jnp.dot(ao_ref[...], w2T[...], preferred_element_type=f32)
         + b_ref[...])
    out_ref[...] = jnp.where(y > 0, y, 0.2 * y)


# ---------------------------------------------------------------------------
# Pallas wrappers
# ---------------------------------------------------------------------------

def gnn_cell(q, A_in, A_out, h_flat):
    BN, H = h_flat.shape
    return pl.pallas_call(
        gnn_kernel,
        out_shape=jax.ShapeDtypeStruct((BN, H), jnp.float32),
    )(A_in, A_out, h_flat,
      q['ein_wT'], q['ein_b'], q['eout_wT'], q['eout_b'],
      q['gnn_wih_in_rT'], q['gnn_wih_in_zT'], q['gnn_wih_in_nT'],
      q['gnn_wih_out_rT'], q['gnn_wih_out_zT'], q['gnn_wih_out_nT'],
      q['gnn_whh_rT'], q['gnn_whh_zT'], q['gnn_whh_nT'],
      q['gnn_bih_r'], q['gnn_bih_z'], q['gnn_bih_n'],
      q['gnn_bhh_r'], q['gnn_bhh_z'], q['gnn_bhh_n'],
      q['b_iah'], q['b_oah'])


def gru_batched(q, x_flat, mask_flat, T, Mp, H):
    return pl.pallas_call(
        gru_kernel,
        out_shape=(jax.ShapeDtypeStruct((T * Mp, H), jnp.float32),
                   jax.ShapeDtypeStruct((Mp, H), jnp.float32)),
        scratch_shapes=[pltpu.VMEM((T * Mp, H), jnp.float32),
                        pltpu.VMEM((T * Mp, H), jnp.float32),
                        pltpu.VMEM((T * Mp, H), jnp.float32)],
    )(x_flat, mask_flat,
      q['gru_wih_rT'], q['gru_wih_zT'], q['gru_wih_nT'],
      q['gru_whh_rT'], q['gru_whh_zT'], q['gru_whh_nT'],
      q['gru_bih_r'], q['gru_bih_z'], q['gru_bih_n'],
      q['gru_bhh_r'], q['gru_bhh_z'], q['gru_bhh_n'])


def hlinear_leaky(q, sh_flat, ao_flat):
    R, H = sh_flat.shape
    return pl.pallas_call(
        hlinear_kernel,
        out_shape=jax.ShapeDtypeStruct((R, H), jnp.float32),
    )(sh_flat, ao_flat, q['hlin_w1T'], q['hlin_w2T'], q['hlin_b'])


# ---------------------------------------------------------------------------
# Host-side glue (data-dependent, mirrors the PyTorch python loops)
# ---------------------------------------------------------------------------

def build_batched_act_seqs(item_np, act_np):
    """Mirror APANet.forward's defaultdict tracking, but emit ONE padded batch
    of sequences for all B*T per-position sequences plus the B full action
    sequences (rows B*T .. B*T+B-1), padded to a multiple of 8 rows."""
    B, T = item_np.shape
    M = B * T + B
    Mp = ((M + 7) // 8) * 8
    padded = np.zeros((Mp, T), dtype=np.int32)
    lengths = np.zeros((Mp,), dtype=np.int32)
    item_actseq = []
    for b in range(B):
        tracking = defaultdict(list)
        action_seq_list = []
        for i, a in zip(item_np[b].tolist(), act_np[b].tolist()):
            tracking[i].append(a)
            action_seq_list.append(tracking[i])   # shared list reference (as in torch)
        if 0 in tracking:
            tracking.pop(0)
        item_actseq.append(tracking)
        for t, s in enumerate(action_seq_list):
            L = len(s)
            padded[b * T + t, :L] = np.asarray(s, dtype=np.int32)
            lengths[b * T + t] = L
        padded[B * T + b, :] = act_np[b]          # full action sequence (length T)
        lengths[B * T + b] = T
    return padded, lengths, item_actseq


def apanet_forward(p, q, inputs, A, action_inputs, item_inputs, step=1):
    H = p['item_emb'].shape[1]
    B, N = inputs.shape
    T = item_inputs.shape[1]

    # --- GNN over item graph (single fused kernel, flattened batch) ----------
    A_in = A[:, :, :N]
    A_out = A[:, :, N:2 * N]
    h_flat = p['item_emb'][inputs].reshape(B * N, H)
    for _ in range(step):
        h_flat = gnn_cell(q, A_in, A_out, h_flat)
    item_hidden = h_flat.reshape(B, N, H)

    # --- build all action sequences once (host) ------------------------------
    padded, lengths, item_actseq = build_batched_act_seqs(
        np.asarray(item_inputs), np.asarray(action_inputs))
    Mp = padded.shape[0]

    # Time-major flattened embedding slab (row t*Mp + m) and lane-dense mask.
    x = p['act_emb'][jnp.asarray(padded.T)].reshape(T * Mp, H)
    mask_np = (np.arange(T, dtype=np.int32)[:, None] < lengths[None, :]).astype(np.float32)
    mask = jnp.asarray(
        np.broadcast_to(mask_np[:, :, None], (T, Mp, H)).reshape(T * Mp, H))

    # --- ONE batched GRU over all (B*T + B) sequences -------------------------
    out_flat, hfin = gru_batched(q, x, mask, T, Mp, H)

    seq_hiddens = hfin[:B * T]                                      # (B*T, H), row b*T+t
    action_output = out_flat.reshape(T, Mp, H)[:, B * T:B * T + B, :]   # (T, B, H)
    action_output = jnp.transpose(action_output, (1, 0, 2)).reshape(B * T, H)

    # --- cat + hlinear + LeakyReLU (flattened) --------------------------------
    y = hlinear_leaky(q, seq_hiddens, action_output)                # (B*T, H)
    return item_hidden, y.reshape(B, T, H), item_actseq


# ---------------------------------------------------------------------------
# Parameter init + host-side weight preparation (transpose / gate split)
# ---------------------------------------------------------------------------

def init_params(key, n_item, n_act, H):
    stdv = 1.0 / math.sqrt(H)
    shapes = {
        'item_emb': (n_item, H),
        'act_emb': (n_act, H),
        'gnn_wih': (3 * H, 2 * H),
        'gnn_whh': (3 * H, H),
        'gnn_bih': (3 * H,),
        'gnn_bhh': (3 * H,),
        'b_iah': (H,),
        'b_oah': (H,),
        'ein_w': (H, H),
        'ein_b': (H,),
        'eout_w': (H, H),
        'eout_b': (H,),
        'gru_wih': (3 * H, H),
        'gru_whh': (3 * H, H),
        'gru_bih': (3 * H,),
        'gru_bhh': (3 * H,),
        'hlin_w': (H, 2 * H),
        'hlin_b': (H,),
    }
    keys = jax.random.split(key, len(shapes))
    return {name: jax.random.uniform(k, shp, jnp.float32, -stdv, stdv)
            for k, (name, shp) in zip(keys, shapes.items())}


def prepare_params(p):
    """Pre-transpose / pre-split all weights once on the host (zero recurring cost)."""
    H = p['ein_w'].shape[0]
    q = {
        'ein_wT': p['ein_w'].T, 'ein_b': p['ein_b'].reshape(1, H),
        'eout_wT': p['eout_w'].T, 'eout_b': p['eout_b'].reshape(1, H),
        'b_iah': p['b_iah'].reshape(1, H), 'b_oah': p['b_oah'].reshape(1, H),
        'hlin_w1T': p['hlin_w'][:, :H].T, 'hlin_w2T': p['hlin_w'][:, H:].T,
        'hlin_b': p['hlin_b'].reshape(1, H),
    }
    wih_in, wih_out = p['gnn_wih'][:, :H], p['gnn_wih'][:, H:]
    for g, name in enumerate(('r', 'z', 'n')):                 # PyTorch gate order
        sl = slice(g * H, (g + 1) * H)
        q[f'gnn_wih_in_{name}T'] = wih_in[sl].T
        q[f'gnn_wih_out_{name}T'] = wih_out[sl].T
        q[f'gnn_whh_{name}T'] = p['gnn_whh'][sl].T
        q[f'gnn_bih_{name}'] = p['gnn_bih'][sl].reshape(1, H)
        q[f'gnn_bhh_{name}'] = p['gnn_bhh'][sl].reshape(1, H)
        q[f'gru_wih_{name}T'] = p['gru_wih'][sl].T
        q[f'gru_whh_{name}T'] = p['gru_whh'][sl].T
        q[f'gru_bih_{name}'] = p['gru_bih'][sl].reshape(1, H)
        q[f'gru_bhh_{name}'] = p['gru_bhh'][sl].reshape(1, H)
    return q


# ---------------------------------------------------------------------------
# Pure-JAX reference (sanity check)
# ---------------------------------------------------------------------------

def ref_gnn_cell(p, A, hidden):
    N = A.shape[1]
    H = hidden.shape[-1]
    h_in = hidden @ p['ein_w'].T + p['ein_b']
    h_out = hidden @ p['eout_w'].T + p['eout_b']
    input_in = jnp.matmul(A[:, :, :N], h_in) + p['b_iah']
    input_out = jnp.matmul(A[:, :, N:2 * N], h_out) + p['b_oah']
    inputs = jnp.concatenate([input_in, input_out], -1)
    gi = inputs @ p['gnn_wih'].T + p['gnn_bih']
    gh = hidden @ p['gnn_whh'].T + p['gnn_bhh']
    i_r, i_i, i_n = gi[..., :H], gi[..., H:2 * H], gi[..., 2 * H:]
    h_r, h_i, h_n = gh[..., :H], gh[..., H:2 * H], gh[..., 2 * H:]
    r = jax.nn.sigmoid(i_r + h_r)
    z = jax.nn.sigmoid(i_i + h_i)
    n = jnp.tanh(i_n + r * h_n)
    return n + z * (hidden - n)


def ref_gru(wih, whh, bih, bhh, x, lengths):
    B, T, H = x.shape
    h = jnp.zeros((B, H), jnp.float32)
    outs = []
    for t in range(T):
        gi = x[:, t] @ wih.T + bih
        gh = h @ whh.T + bhh
        r = jax.nn.sigmoid(gi[:, :H] + gh[:, :H])
        z = jax.nn.sigmoid(gi[:, H:2 * H] + gh[:, H:2 * H])
        n = jnp.tanh(gi[:, 2 * H:] + r * gh[:, 2 * H:])
        hn = (1 - z) * n + z * h
        m = (t < lengths)[:, None].astype(jnp.float32)
        h = m * hn + (1 - m) * h
        outs.append(h)
    return jnp.stack(outs, 1), h


def ref_forward(p, inputs, A, action_inputs, item_inputs, step=1):
    item_hidden = p['item_emb'][inputs]
    for _ in range(step):
        item_hidden = ref_gnn_cell(p, A, item_hidden)
    B, T = item_inputs.shape
    padded, lengths, _ = build_batched_act_seqs(
        np.asarray(item_inputs), np.asarray(action_inputs))
    hs = []
    for b in range(B):
        xb = p['act_emb'][jnp.asarray(padded[b * T:(b + 1) * T])]        # (T, T, H)
        _, hf = ref_gru(p['gru_wih'], p['gru_whh'], p['gru_bih'], p['gru_bhh'],
                        xb, jnp.asarray(lengths[b * T:(b + 1) * T]))
        hs.append(hf)
    seq_hiddens = jnp.stack(hs, 0)                                       # (B, T, H)
    act_emb = p['act_emb'][action_inputs]
    ao, _ = ref_gru(p['gru_wih'], p['gru_whh'], p['gru_bih'], p['gru_bhh'],
                    act_emb, jnp.full((B,), T, jnp.int32))
    cat = jnp.concatenate([seq_hiddens, ao], -1)
    y = cat @ p['hlin_w'].T + p['hlin_b']
    return item_hidden, jnp.where(y > 0, y, 0.2 * y)


# ---------------------------------------------------------------------------

if __name__ == "__main__":
    B, N, T, H = 2, 8, 8, 32       # batch, graph nodes, seq len, hidden
    n_item, n_act = 20, 6

    key = jax.random.PRNGKey(0)
    kp, k1, k2, k3, k4 = jax.random.split(key, 5)
    params = init_params(kp, n_item, n_act, H)
    prepped = prepare_params(params)

    inputs = jax.random.randint(k1, (B, N), 0, n_item)          # unique session items
    A = jax.random.uniform(k2, (B, N, 2 * N), jnp.float32)       # [A_in | A_out]
    action_inputs = jax.random.randint(k3, (B, T), 0, n_act)
    item_inputs = jax.random.randint(k4, (B, T), 0, n_item)

    item_hidden, seq_hiddens, item_actseq = apanet_forward(
        params, prepped, inputs, A, action_inputs, item_inputs, step=1)
    jax.block_until_ready((item_hidden, seq_hiddens))

    # sanity check against pure-JAX reference
    ih_ref, sh_ref = ref_forward(params, inputs, A, action_inputs, item_inputs, step=1)
    assert np.allclose(np.asarray(item_hidden), np.asarray(ih_ref), atol=1e-2, rtol=1e-2)
    assert np.allclose(np.asarray(seq_hiddens), np.asarray(sh_ref), atol=1e-2, rtol=1e-2)

    print("KERNEL_OK")
</pallas_src>

<mosaic_0001>
module attributes {stable_mosaic.version = 11 : i64} {
  func.func @gnn_kernel(%arg0: memref<2x8x8xf32, #tpu.memory_space<vmem>>, %arg1: memref<2x8x8xf32, #tpu.memory_space<vmem>>, %arg2: memref<16x32xf32, #tpu.memory_space<vmem>>, %arg3: memref<32x32xf32, #tpu.memory_space<vmem>>, %arg4: memref<1x32xf32, #tpu.memory_space<vmem>>, %arg5: memref<32x32xf32, #tpu.memory_space<vmem>>, %arg6: memref<1x32xf32, #tpu.memory_space<vmem>>, %arg7: memref<32x32xf32, #tpu.memory_space<vmem>>, %arg8: memref<32x32xf32, #tpu.memory_space<vmem>>, %arg9: memref<32x32xf32, #tpu.memory_space<vmem>>, %arg10: memref<32x32xf32, #tpu.memory_space<vmem>>, %arg11: memref<32x32xf32, #tpu.memory_space<vmem>>, %arg12: memref<32x32xf32, #tpu.memory_space<vmem>>, %arg13: memref<32x32xf32, #tpu.memory_space<vmem>>, %arg14: memref<32x32xf32, #tpu.memory_space<vmem>>, %arg15: memref<32x32xf32, #tpu.memory_space<vmem>>, %arg16: memref<1x32xf32, #tpu.memory_space<vmem>>, %arg17: memref<1x32xf32, #tpu.memory_space<vmem>>, %arg18: memref<1x32xf32, #tpu.memory_space<vmem>>, %arg19: memref<1x32xf32, #tpu.memory_space<vmem>>, %arg20: memref<1x32xf32, #tpu.memory_space<vmem>>, %arg21: memref<1x32xf32, #tpu.memory_space<vmem>>, %arg22: memref<1x32xf32, #tpu.memory_space<vmem>>, %arg23: memref<1x32xf32, #tpu.memory_space<vmem>>, %arg24: memref<16x32xf32, #tpu.memory_space<vmem>>) attributes {dimension_semantics = [], scalar_prefetch = 0 : i64, scratch_operands = 0 : i64, tpu.core_type = #tpu.core_type<tc>} {
    %c0 = arith.constant 0 : index
    %c0_0 = arith.constant 0 : index
    %0 = vector.load %arg2[%c0, %c0_0] : memref<16x32xf32, #tpu.memory_space<vmem>>, vector<16x32xf32>
    %c0_1 = arith.constant 0 : index
    %c0_2 = arith.constant 0 : index
    %1 = vector.load %arg3[%c0_1, %c0_2] : memref<32x32xf32, #tpu.memory_space<vmem>>, vector<32x32xf32>
    %cst = arith.constant dense<0.000000e+00> : vector<16x32xf32>
    %2 = tpu.matmul %0, %1, %cst {dimension_numbers = #tpu.dot_dimension_numbers<[1], [0], [0], [1], [0, 0, 1, 1], [], []>} : vector<16x32xf32>, vector<32x32xf32>, vector<16x32xf32> -> vector<16x32xf32>
    %c0_3 = arith.constant 0 : index
    %c0_4 = arith.constant 0 : index
    %3 = vector.load %arg4[%c0_3, %c0_4] : memref<1x32xf32, #tpu.memory_space<vmem>>, vector<1x32xf32>
    %4 = vector.broadcast %3 : vector<1x32xf32> to vector<16x32xf32>
    %5 = arith.addf %2, %4 : vector<16x32xf32>
    %c0_5 = arith.constant 0 : index
    %c0_6 = arith.constant 0 : index
    %6 = vector.load %arg5[%c0_5, %c0_6] : memref<32x32xf32, #tpu.memory_space<vmem>>, vector<32x32xf32>
    %cst_7 = arith.constant dense<0.000000e+00> : vector<16x32xf32>
    %7 = tpu.matmul %0, %6, %cst_7 {dimension_numbers = #tpu.dot_dimension_numbers<[1], [0], [0], [1], [0, 0, 1, 1], [], []>} : vector<16x32xf32>, vector<32x32xf32>, vector<16x32xf32> -> vector<16x32xf32>
    %c0_8 = arith.constant 0 : index
    %c0_9 = arith.constant 0 : index
    %8 = vector.load %arg6[%c0_8, %c0_9] : memref<1x32xf32, #tpu.memory_space<vmem>>, vector<1x32xf32>
    %9 = vector.broadcast %8 : vector<1x32xf32> to vector<16x32xf32>
    %10 = arith.addf %7, %9 : vector<16x32xf32>
    %c0_10 = arith.constant 0 : index
    %c0_11 = arith.constant 0 : index
    %c0_12 = arith.constant 0 : index
    %11 = vector.load %arg0[%c0_10, %c0_11, %c0_12] : memref<2x8x8xf32, #tpu.memory_space<vmem>>, vector<1x8x8xf32>
    %12 = vector.shape_cast %11 : vector<1x8x8xf32> to vector<8x8xf32>
    %13 = vector.extract_strided_slice %5 {offsets = [0, 0], sizes = [8, 32], strides = [1, 1]} : vector<16x32xf32> to vector<8x32xf32>
    %cst_13 = arith.constant dense<0.000000e+00> : vector<8x32xf32>
    %14 = tpu.matmul %12, %13, %cst_13 {dimension_numbers = #tpu.dot_dimension_numbers<[1], [0], [0], [1], [0, 0, 1, 1], [], []>} : vector<8x8xf32>, vector<8x32xf32>, vector<8x32xf32> -> vector<8x32xf32>
    %c0_14 = arith.constant 0 : index
    %c0_15 = arith.constant 0 : index
    %c0_16 = arith.constant 0 : index
    %15 = vector.load %arg1[%c0_14, %c0_15, %c0_16] : memref<2x8x8xf32, #tpu.memory_space<vmem>>, vector<1x8x8xf32>
    %16 = vector.shape_cast %15 : vector<1x8x8xf32> to vector<8x8xf32>
    %17 = vector.extract_strided_slice %10 {offsets = [0, 0], sizes = [8, 32], strides = [1, 1]} : vector<16x32xf32> to vector<8x32xf32>
    %cst_17 = arith.constant dense<0.000000e+00> : vector<8x32xf32>
    %18 = tpu.matmul %16, %17, %cst_17 {dimension_numbers = #tpu.dot_dimension_numbers<[1], [0], [0], [1], [0, 0, 1, 1], [], []>} : vector<8x8xf32>, vector<8x32xf32>, vector<8x32xf32> -> vector<8x32xf32>
    %c1 = arith.constant 1 : index
    %c0_18 = arith.constant 0 : index
    %c0_19 = arith.constant 0 : index
    %19 = vector.load %arg0[%c1, %c0_18, %c0_19] : memref<2x8x8xf32, #tpu.memory_space<vmem>>, vector<1x8x8xf32>
    %20 = vector.shape_cast %19 : vector<1x8x8xf32> to vector<8x8xf32>
    %21 = vector.extract_strided_slice %5 {offsets = [8, 0], sizes = [8, 32], strides = [1, 1]} : vector<16x32xf32> to vector<8x32xf32>
    %cst_20 = arith.constant dense<0.000000e+00> : vector<8x32xf32>
    %22 = tpu.matmul %20, %21, %cst_20 {dimension_numbers = #tpu.dot_dimension_numbers<[1], [0], [0], [1], [0, 0, 1, 1], [], []>} : vector<8x8xf32>, vector<8x32xf32>, vector<8x32xf32> -> vector<8x32xf32>
    %c1_21 = arith.constant 1 : index
    %c0_22 = arith.constant 0 : index
    %c0_23 = arith.constant 0 : index
    %23 = vector.load %arg1[%c1_21, %c0_22, %c0_23] : memref<2x8x8xf32, #tpu.memory_space<vmem>>, vector<1x8x8xf32>
    %24 = vector.shape_cast %23 : vector<1x8x8xf32> to vector<8x8xf32>
    %25 = vector.extract_strided_slice %10 {offsets = [8, 0], sizes = [8, 32], strides = [1, 1]} : vector<16x32xf32> to vector<8x32xf32>
    %cst_24 = arith.constant dense<0.000000e+00> : vector<8x32xf32>
    %26 = tpu.matmul %24, %25, %cst_24 {dimension_numbers = #tpu.dot_dimension_numbers<[1], [0], [0], [1], [0, 0, 1, 1], [], []>} : vector<8x8xf32>, vector<8x32xf32>, vector<8x32xf32> -> vector<8x32xf32>
    %27 = tpu.concatenate %14, %22 in 0 : vector<8x32xf32>, vector<8x32xf32> -> vector<16x32xf32>
    %c0_25 = arith.constant 0 : index
    %c0_26 = arith.constant 0 : index
    %28 = vector.load %arg22[%c0_25, %c0_26] : memref<1x32xf32, #tpu.memory_space<vmem>>, vector<1x32xf32>
    %29 = vector.broadcast %28 : vector<1x32xf32> to vector<16x32xf32>
    %30 = arith.addf %27, %29 : vector<16x32xf32>
    %31 = tpu.concatenate %18, %26 in 0 : vector<8x32xf32>, vector<8x32xf32> -> vector<16x32xf32>
    %c0_27 = arith.constant 0 : index
    %c0_28 = arith.constant 0 : index
    %32 = vector.load %arg23[%c0_27, %c0_28] : memref<1x32xf32, #tpu.memory_space<vmem>>, vector<1x32xf32>
    %33 = vector.broadcast %32 : vector<1x32xf32> to vector<16x32xf32>
    %34 = arith.addf %31, %33 : vector<16x32xf32>
    %c0_29 = arith.constant 0 : index
    %c0_30 = arith.constant 0 : index
    %35 = vector.load %arg7[%c0_29, %c0_30] : memref<32x32xf32, #tpu.memory_space<vmem>>, vector<32x32xf32>
    %cst_31 = arith.constant dense<0.000000e+00> : vector<16x32xf32>
    %36 = tpu.matmul %30, %35, %cst_31 {dimension_numbers = #tpu.dot_dimension_numbers<[1], [0], [0], [1], [0, 0, 1, 1], [], []>} : vector<16x32xf32>, vector<32x32xf32>, vector<16x32xf32> -> vector<16x32xf32>
    %c0_32 = arith.constant 0 : index
    %c0_33 = arith.constant 0 : index
    %37 = vector.load %arg10[%c0_32, %c0_33] : memref<32x32xf32, #tpu.memory_space<vmem>>, vector<32x32xf32>
    %cst_34 = arith.constant dense<0.000000e+00> : vector<16x32xf32>
    %38 = tpu.matmul %34, %37, %cst_34 {dimension_numbers = #tpu.dot_dimension_numbers<[1], [0], [0], [1], [0, 0, 1, 1], [], []>} : vector<16x32xf32>, vector<32x32xf32>, vector<16x32xf32> -> vector<16x32xf32>
    %39 = arith.addf %36, %38 : vector<16x32xf32>
    %c0_35 = arith.constant 0 : index
    %c0_36 = arith.constant 0 : index
    %40 = vector.load %arg16[%c0_35, %c0_36] : memref<1x32xf32, #tpu.memory_space<vmem>>, vector<1x32xf32>
    %41 = vector.broadcast %40 : vector<1x32xf32> to vector<16x32xf32>
    %42 = arith.addf %39, %41 : vector<16x32xf32>
    %c0_37 = arith.constant 0 : index
    %c0_38 = arith.constant 0 : index
    %43 = vector.load %arg8[%c0_37, %c0_38] : memref<32x32xf32, #tpu.memory_space<vmem>>, vector<32x32xf32>
    %cst_39 = arith.constant dense<0.000000e+00> : vector<16x32xf32>
    %44 = tpu.matmul %30, %43, %cst_39 {dimension_numbers = #tpu.dot_dimension_numbers<[1], [0], [0], [1], [0, 0, 1, 1], [], []>} : vector<16x32xf32>, vector<32x32xf32>, vector<16x32xf32> -> vector<16x32xf32>
    %c0_40 = arith.constant 0 : index
    %c0_41 = arith.constant 0 : index
    %45 = vector.load %arg11[%c0_40, %c0_41] : memref<32x32xf32, #tpu.memory_space<vmem>>, vector<32x32xf32>
    %cst_42 = arith.constant dense<0.000000e+00> : vector<16x32xf32>
    %46 = tpu.matmul %34, %45, %cst_42 {dimension_numbers = #tpu.dot_dimension_numbers<[1], [0], [0], [1], [0, 0, 1, 1], [], []>} : vector<16x32xf32>, vector<32x32xf32>, vector<16x32xf32> -> vector<16x32xf32>
    %47 = arith.addf %44, %46 : vector<16x32xf32>
    %c0_43 = arith.constant 0 : index
    %c0_44 = arith.constant 0 : index
    %48 = vector.load %arg17[%c0_43, %c0_44] : memref<1x32xf32, #tpu.memory_space<vmem>>, vector<1x32xf32>
    %49 = vector.broadcast %48 : vector<1x32xf32> to vector<16x32xf32>
    %50 = arith.addf %47, %49 : vector<16x32xf32>
    %c0_45 = arith.constant 0 : index
    %c0_46 = arith.constant 0 : index
    %51 = vector.load %arg9[%c0_45, %c0_46] : memref<32x32xf32, #tpu.memory_space<vmem>>, vector<32x32xf32>
    %cst_47 = arith.constant dense<0.000000e+00> : vector<16x32xf32>
    %52 = tpu.matmul %30, %51, %cst_47 {dimension_numbers = #tpu.dot_dimension_numbers<[1], [0], [0], [1], [0, 0, 1, 1], [], []>} : vector<16x32xf32>, vector<32x32xf32>, vector<16x32xf32> -> vector<16x32xf32>
    %c0_48 = arith.constant 0 : index
    %c0_49 = arith.constant 0 : index
    %53 = vector.load %arg12[%c0_48, %c0_49] : memref<32x32xf32, #tpu.memory_space<vmem>>, vector<32x32xf32>
    %cst_50 = arith.constant dense<0.000000e+00> : vector<16x32xf32>
    %54 = tpu.matmul %34, %53, %cst_50 {dimension_numbers = #tpu.dot_dimension_numbers<[1], [0], [0], [1], [0, 0, 1, 1], [], []>} : vector<16x32xf32>, vector<32x32xf32>, vector<16x32xf32> -> vector<16x32xf32>
    %55 = arith.addf %52, %54 : vector<16x32xf32>
    %c0_51 = arith.constant 0 : index
    %c0_52 = arith.constant 0 : index
    %56 = vector.load %arg18[%c0_51, %c0_52] : memref<1x32xf32, #tpu.memory_space<vmem>>, vector<1x32xf32>
    %57 = vector.broadcast %56 : vector<1x32xf32> to vector<16x32xf32>
    %58 = arith.addf %55, %57 : vector<16x32xf32>
    %c0_53 = arith.constant 0 : index
    %c0_54 = arith.constant 0 : index
    %59 = vector.load %arg13[%c0_53, %c0_54] : memref<32x32xf32, #tpu.memory_space<vmem>>, vector<32x32xf32>
    %cst_55 = arith.constant dense<0.000000e+00> : vector<16x32xf32>
    %60 = tpu.matmul %0, %59, %cst_55 {dimension_numbers = #tpu.dot_dimension_numbers<[1], [0], [0], [1], [0, 0, 1, 1], [], []>} : vector<16x32xf32>, vector<32x32xf32>, vector<16x32xf32> -> vector<16x32xf32>
    %c0_56 = arith.constant 0 : index
    %c0_57 = arith.constant 0 : index
    %61 = vector.load %arg19[%c0_56, %c0_57] : memref<1x32xf32, #tpu.memory_space<vmem>>, vector<1x32xf32>
    %62 = vector.broadcast %61 : vector<1x32xf32> to vector<16x32xf32>
    %63 = arith.addf %60, %62 : vector<16x32xf32>
    %c0_58 = arith.constant 0 : index
    %c0_59 = arith.constant 0 : index
    %64 = vector.load %arg14[%c0_58, %c0_59] : memref<32x32xf32, #tpu.memory_space<vmem>>, vector<32x32xf32>
    %cst_60 = arith.constant dense<0.000000e+00> : vector<16x32xf32>
    %65 = tpu.matmul %0, %64, %cst_60 {dimension_numbers = #tpu.dot_dimension_numbers<[1], [0], [0], [1], [0, 0, 1, 1], [], []>} : vector<16x32xf32>, vector<32x32xf32>, vector<16x32xf32> -> vector<16x32xf32>
    %c0_61 = arith.constant 0 : index
    %c0_62 = arith.constant 0 : index
    %66 = vector.load %arg20[%c0_61, %c0_62] : memref<1x32xf32, #tpu.memory_space<vmem>>, vector<1x32xf32>
    %67 = vector.broadcast %66 : vector<1x32xf32> to vector<16x32xf32>
    %68 = arith.addf %65, %67 : vector<16x32xf32>
    %c0_63 = arith.constant 0 : index
    %c0_64 = arith.constant 0 : index
    %69 = vector.load %arg15[%c0_63, %c0_64] : memref<32x32xf32, #tpu.memory_space<vmem>>, vector<32x32xf32>
    %cst_65 = arith.constant dense<0.000000e+00> : vector<16x32xf32>
    %70 = tpu.matmul %0, %69, %cst_65 {dimension_numbers = #tpu.dot_dimension_numbers<[1], [0], [0], [1], [0, 0, 1, 1], [], []>} : vector<16x32xf32>, vector<32x32xf32>, vector<16x32xf32> -> vector<16x32xf32>
    %c0_66 = arith.constant 0 : index
    %c0_67 = arith.constant 0 : index
    %71 = vector.load %arg21[%c0_66, %c0_67] : memref<1x32xf32, #tpu.memory_space<vmem>>, vector<1x32xf32>
    %72 = vector.broadcast %71 : vector<1x32xf32> to vector<16x32xf32>
    %73 = arith.addf %70, %72 : vector<16x32xf32>
    %74 = arith.addf %42, %63 : vector<16x32xf32>
    %75 = arith.negf %74 : vector<16x32xf32>
    %76 = math.exp %75 : vector<16x32xf32>
    %cst_68 = arith.constant 1.000000e+00 : f32
    %77 = vector.broadcast %cst_68 : f32 to vector<16x32xf32>
    %78 = arith.addf %77, %76 : vector<16x32xf32>
    %79 = arith.divf %77, %78 : vector<16x32xf32>
    %80 = arith.addf %50, %68 : vector<16x32xf32>
    %81 = arith.negf %80 : vector<16x32xf32>
    %82 = math.exp %81 : vector<16x32xf32>
    %cst_69 = arith.constant 1.000000e+00 : f32
    %83 = vector.broadcast %cst_69 : f32 to vector<16x32xf32>
    %84 = arith.addf %83, %82 : vector<16x32xf32>
    %85 = arith.divf %83, %84 : vector<16x32xf32>
    %86 = arith.mulf %79, %73 : vector<16x32xf32>
    %87 = arith.addf %58, %86 : vector<16x32xf32>
    %88 = math.tanh %87 : vector<16x32xf32>
    %89 = arith.subf %0, %88 : vector<16x32xf32>
    %90 = arith.mulf %85, %89 : vector<16x32xf32>
    %91 = arith.addf %88, %90 : vector<16x32xf32>
    %c0_70 = arith.constant 0 : index
    %c0_71 = arith.constant 0 : index
    %92 = vector.load %arg24[%c0_70, %c0_71] : memref<16x32xf32, #tpu.memory_space<vmem>>, vector<16x32xf32>
    tpu.vector_store %arg24[%c0_70, %c0_71], %91 {strides = array<i32>} : memref<16x32xf32, #tpu.memory_space<vmem>>, vector<16x32xf32>,
    return
  }
}

</mosaic_0001>

<bundles_post_ra>
// kernel: tpu_custom_call.1
= control target key start
LH: loop header
LB: loop body
LE: loop exit
PB: predicated region body
PF: predicated region fallthrough
CT: control target
= control target key end

     0   :  { %s2796_s0 = inlined_call_operand.hbm [shape: f32[2,8,8], index: 0, kind: input, shape index: {}]   ;;  %s2797_s1 = inlined_call_operand.hbm [shape: f32[2,8,8], index: 1, kind: input, shape index: {}]   ;;  %s2798_s2 = inlined_call_operand.hbm [shape: f32[16,32], index: 2, kind: input, shape index: {}]   ;;  %s2799_s3 = inlined_call_operand.hbm [shape: f32[32,32], index: 3, kind: input, shape index: {}]   ;;  %s2800_s4 = inlined_call_operand.vmem [shape: f32[1,32], index: 4, kind: input, shape index: {}]   ;;  %s2801_s5 = inlined_call_operand.hbm [shape: f32[32,32], index: 5, kind: input, shape index: {}]   ;;  %s2802_s6 = inlined_call_operand.vmem [shape: f32[1,32], index: 6, kind: input, shape index: {}]   ;;  %s2803_s7 = inlined_call_operand.hbm [shape: f32[32,32], index: 7, kind: input, shape index: {}]   ;;  %s2804_s8 = inlined_call_operand.hbm [shape: f32[32,32], index: 8, kind: input, shape index: {}]   ;;  %s2805_s9 = inlined_call_operand.vmem [shape: f32[32,32], index: 9, kind: input, shape index: {}]   ;;  %s2806_s10 = inlined_call_operand.hbm [shape: f32[32,32], index: 10, kind: input, shape index: {}]   ;;  %s2807_s11 = inlined_call_operand.hbm [shape: f32[32,32], index: 11, kind: input, shape index: {}]   ;;  %s2808_s12 = inlined_call_operand.hbm [shape: f32[32,32], index: 12, kind: input, shape index: {}]   ;;  %s2809_s13 = inlined_call_operand.hbm [shape: f32[32,32], index: 13, kind: input, shape index: {}]   ;;  %s2810_s14 = inlined_call_operand.hbm [shape: f32[32,32], index: 14, kind: input, shape index: {}]   ;;  %s2811_s15 = inlined_call_operand.hbm [shape: f32[32,32], index: 15, kind: input, shape index: {}]   ;;  %s2812_s16 = inlined_call_operand.vmem [shape: f32[1,32], index: 16, kind: input, shape index: {}]   ;;  %s2813_s17 = inlined_call_operand.vmem [shape: f32[1,32], index: 17, kind: input, shape index: {}]   ;;  %s2814_s18 = inlined_call_operand.vmem [shape: f32[1,32], index: 18, kind: input, shape index: {}]   ;;  %s2815_s19 = inlined_call_operand.vmem [shape: f32[1,32], index: 19, kind: input, shape index: {}]   ;;  %s2816_s20 = inlined_call_operand.vmem [shape: f32[1,32], index: 20, kind: input, shape index: {}]   ;;  %s2817_s21 = inlined_call_operand.vmem [shape: f32[1,32], index: 21, kind: input, shape index: {}]   ;;  %s2818_s22 = inlined_call_operand.vmem [shape: f32[1,32], index: 22, kind: input, shape index: {}]   ;;  %s2819_s23 = inlined_call_operand.vmem [shape: f32[1,32], index: 23, kind: input, shape index: {}]   ;;  %s2820_s24 = inlined_call_operand.hbm [shape: f32[16,32], index: 24, kind: output, shape index: {}]  }
   0x1   :  { %2829 = sst [smem:[#allocation32_spill]] %s2796_s0 }
   0x2   :  { %2830 = sst [smem:[#allocation33_spill]] %s2797_s1 }
   0x3   :  { %2831 = sst [smem:[#allocation34_spill]] %s2798_s2 }
   0x4   :  { %2832 = sst [smem:[#allocation35_spill]] %s2799_s3 }
   0x5   :  { %2833 = sst [smem:[#allocation36_spill]] %s2800_s4 }
   0x6   :  { %2834 = sst [smem:[#allocation37_spill]] %s2801_s5 }
   0x7   :  { %2835 = sst [smem:[#allocation38_spill]] %s2802_s6 }
   0x8   :  { %2836 = sst [smem:[#allocation39_spill]] %s2803_s7 }
   0x9   :  { %2837 = sst [smem:[#allocation40_spill]] %s2804_s8 }
   0xa   :  { %2838 = sst [smem:[#allocation41_spill]] %s2814_s18 }
   0xb   :  { %2839 = sst [smem:[#allocation42_spill]] %s2817_s21 }
   0xc   :  { %2840 = sst [smem:[#allocation43_spill]] %s2820_s24 }
   0xd   :  { %29 = vsyncpa [#allocation3], 0 }
   0xe   :  { %30 = vsyncpa [#allocation6], 0 }
   0xf   :  { %31 = vsyncpa [#allocation9], 0 }
  0x10   :  { %32 = vsyncpa [#allocation12], 0 }
  0x11   :  { %33 = vsyncpa [#allocation15], 0 }
  0x12   :  { %34 = vsyncpa [#allocation18], 0 }
  0x13   :  { %35 = vsyncpa [#allocation21], 0 }
  0x14   :  { %36 = vsyncpa [#allocation4], 0  ;;  %s2311_s5 = smov [#allocation5]   ;;  %s2312_s27 = smov [#allocation8]  }
  0x15   :  { %s54_s26 = sshll.u32 %s2311_s5, 4  ;;  %s78_s28 = sshll.u32 %s2312_s27, 4  ;;  %s55_s26 = int_to_ptr.vmem [resolvable:$true] %s54_s26  ;;  %s2454_s28 = int_to_ptr.vmem [resolvable:$true] %s78_s28 }
  0x16   :  { %s2841_s29 = sld [smem:[#allocation33_spill]] }
  0x1c   :  { %s1987_s0 = scalar_lea.hbm %s2841_s29, 256 }
  0x1d   :  { %p1988_p0 = scmp.ne.s32.totalorder %s2841_s29, %s1987_s0  ;;  %p1991_p1 = scmp.lt.u32.totalorder %s1987_s0, %s2841_s29 }
  0x1f   :  { %p1993_p2 = pnand %p1991_p1, %p1988_p0 }
  0x21   :  { %1996 = shalt.err (!%p1993_p2)
}
  0x22   :  { %s1997_s8 = scalar_lea.vmem %s55_s26, 256  ;;  %p2002_p4 = scmp.lt.s32.totalorder %s55_s26, %s55_s26 }
  0x23   :  { %p1998_p3 = scmp.ne.s32.totalorder %s55_s26, %s1997_s8  ;;  %p2003_p5 = scmp.lt.s32.totalorder %s1997_s8, %s1997_s8 }
  0x25   :  { %p2004_p6 = por %p2003_p5, %p2002_p4 }
  0x27   :  { %p2005_p7 = pnand %p2004_p6, %p1998_p3 }
  0x29   :  { %2008 = shalt.err (!%p2005_p7)
}
  0x2a   :  { %s2313_s4 = smov 128   ;;  %s2314_s1 = smov 8  }
  0x2b   :  { %60 = dma.hbm_to_vmem [thread:$0]  %s2841_s29, 256, %s55_s26, [#allocation6], %s2313_s4, %s2313_s4, %s2314_s1  }
  0x2c   :  { %s2842_s0 = sld [smem:[#allocation35_spill]] }
  0x32   :  { %s2009_s7 = scalar_lea.hbm %s2842_s0, 512 }
  0x33   :  { %p2010_p8 = scmp.ne.s32.totalorder %s2842_s0, %s2009_s7  ;;  %p2013_p9 = scmp.lt.u32.totalorder %s2009_s7, %s2842_s0 }
  0x35   :  { %p2015_p10 = pnand %p2013_p9, %p2010_p8 }
  0x37   :  { %2018 = shalt.err (!%p2015_p10)
}
  0x38   :  { %s2019_s24 = scalar_lea.vmem %s2454_s28, 512  ;;  %p2024_p12 = scmp.lt.s32.totalorder %s2454_s28, %s2454_s28 }
  0x39   :  { %p2020_p11 = scmp.ne.s32.totalorder %s2454_s28, %s2019_s24  ;;  %p2025_p13 = scmp.lt.s32.totalorder %s2019_s24, %s2019_s24 }
  0x3b   :  { %p2026_p0 = por %p2025_p13, %p2024_p12 }
  0x3d   :  { %p2027_p1 = pnand %p2026_p0, %p2020_p11 }
  0x3f   :  { %2030 = shalt.err (!%p2027_p1)
}
  0x40   :  { %84 = dma.hbm_to_vmem [thread:$0]  %s2842_s0, 512, %s2454_s28, [#allocation9], %s2313_s4, %s2313_s4, %s2314_s1  }
  0x41   :  { %s2315_s5 = smov [#allocation11]   ;;  %s2316_s6 = smov [#allocation14]  }
  0x42   :  { %s106_s27 = sshll.u32 %s2315_s5, 4  ;;  %s132_s2 = sshll.u32 %s2316_s6, 4  ;;  %s107_s27 = int_to_ptr.vmem [resolvable:$true] %s106_s27  ;;  %s2491_s2 = int_to_ptr.vmem [resolvable:$true] %s132_s2 }
  0x43   :  { %s2843_s30 = sld [smem:[#allocation39_spill]] }
  0x49   :  { %s2031_s3 = scalar_lea.hbm %s2843_s30, 512 }
  0x4a   :  { %p2032_p2 = scmp.ne.s32.totalorder %s2843_s30, %s2031_s3  ;;  %p2035_p3 = scmp.lt.u32.totalorder %s2031_s3, %s2843_s30 }
  0x4c   :  { %p2037_p4 = pnand %p2035_p3, %p2032_p2 }
  0x4e   :  { %2040 = shalt.err (!%p2037_p4)
}
  0x4f   :  { %s2041_s28 = scalar_lea.vmem %s107_s27, 512  ;;  %p2046_p6 = scmp.lt.s32.totalorder %s107_s27, %s107_s27 }
  0x50   :  { %p2042_p5 = scmp.ne.s32.totalorder %s107_s27, %s2041_s28  ;;  %p2047_p7 = scmp.lt.s32.totalorder %s2041_s28, %s2041_s28 }
  0x52   :  { %p2048_p8 = por %p2047_p7, %p2046_p6 }
  0x54   :  { %p2049_p9 = pnand %p2048_p8, %p2042_p5 }
  0x56   :  { %2052 = shalt.err (!%p2049_p9)
}
  0x57   :  { %112 = dma.hbm_to_vmem [thread:$0]  %s2843_s30, 512, %s107_s27, [#allocation12], %s2313_s4, %s2313_s4, %s2314_s1  }
  0x58   :  { %s2053_s18 = scalar_lea.hbm %s2806_s10, 512 }
  0x59   :  { %p2054_p10 = scmp.ne.s32.totalorder %s2806_s10, %s2053_s18  ;;  %p2057_p11 = scmp.lt.u32.totalorder %s2053_s18, %s2806_s10 }
  0x5b   :  { %p2059_p12 = pnand %p2057_p11, %p2054_p10 }
  0x5d   :  { %2062 = shalt.err (!%p2059_p12)
}
  0x5e   :  { %s2063_s3 = scalar_lea.vmem %s2491_s2, 512  ;;  %p2068_p0 = scmp.lt.s32.totalorder %s2491_s2, %s2491_s2 }
  0x5f   :  { %p2064_p13 = scmp.ne.s32.totalorder %s2491_s2, %s2063_s3  ;;  %p2069_p1 = scmp.lt.s32.totalorder %s2063_s3, %s2063_s3 }
  0x61   :  { %p2070_p2 = por %p2069_p1, %p2068_p0 }
  0x63   :  { %p2071_p3 = pnand %p2070_p2, %p2064_p13 }
  0x65   :  { %2074 = shalt.err (!%p2071_p3)
}
  0x66   :  { %138 = dma.hbm_to_vmem [thread:$0]  %s2806_s10, 512, %s2491_s2, [#allocation15], %s2313_s4, %s2313_s4, %s2314_s1  }
  0x67   :  { %s2317_s25 = smov [#allocation17]   ;;  %s2318_s28 = smov [#allocation20]  }
  0x68   :  { %s156_s8 = sshll.u32 %s2317_s25, 4  ;;  %s180_s0 = sshll.u32 %s2318_s28, 4  ;;  %s157_s8 = int_to_ptr.vmem [resolvable:$true] %s156_s8  ;;  %s2528_s0 = int_to_ptr.vmem [resolvable:$true] %s180_s0 }
  0x69   :  { %s2075_s5 = scalar_lea.hbm %s2808_s12, 512 }
  0x6a   :  { %p2076_p4 = scmp.ne.s32.totalorder %s2808_s12, %s2075_s5  ;;  %p2079_p5 = scmp.lt.u32.totalorder %s2075_s5, %s2808_s12 }
  0x6c   :  { %p2081_p6 = pnand %p2079_p5, %p2076_p4 }
  0x6e   :  { %2084 = shalt.err (!%p2081_p6)
}
  0x6f   :  { %s2085_s10 = scalar_lea.vmem %s157_s8, 512  ;;  %p2090_p8 = scmp.lt.s32.totalorder %s157_s8, %s157_s8 }
  0x70   :  { %p2086_p7 = scmp.ne.s32.totalorder %s157_s8, %s2085_s10  ;;  %p2091_p9 = scmp.lt.s32.totalorder %s2085_s10, %s2085_s10 }
  0x72   :  { %p2092_p10 = por %p2091_p9, %p2090_p8 }
  0x74   :  { %p2093_p11 = pnand %p2092_p10, %p2086_p7 }
  0x76   :  { %2096 = shalt.err (!%p2093_p11)
}
  0x77   :  { %162 = dma.hbm_to_vmem [thread:$0]  %s2808_s12, 512, %s157_s8, [#allocation18], %s2313_s4, %s2313_s4, %s2314_s1  }
  0x78   :  { %s2097_s30 = scalar_lea.hbm %s2810_s14, 512 }
  0x79   :  { %p2098_p12 = scmp.ne.s32.totalorder %s2810_s14, %s2097_s30  ;;  %p2101_p13 = scmp.lt.u32.totalorder %s2097_s30, %s2810_s14 }
  0x7b   :  { %p2103_p0 = pnand %p2101_p13, %p2098_p12 }
  0x7d   :  { %2106 = shalt.err (!%p2103_p0)
}
  0x7e   :  { %s2107_s5 = scalar_lea.vmem %s2528_s0, 512  ;;  %p2112_p2 = scmp.lt.s32.totalorder %s2528_s0, %s2528_s0 }
  0x7f   :  { %p2108_p1 = scmp.ne.s32.totalorder %s2528_s0, %s2107_s5  ;;  %p2113_p3 = scmp.lt.s32.totalorder %s2107_s5, %s2107_s5 }
  0x81   :  { %p2114_p4 = por %p2113_p3, %p2112_p2 }
  0x83   :  { %p2115_p5 = pnand %p2114_p4, %p2108_p1 }
  0x85   :  { %2118 = shalt.err (!%p2115_p5)
}
  0x86   :  { %186 = dma.hbm_to_vmem [thread:$0]  %s2810_s14, 512, %s2528_s0, [#allocation21], %s2313_s4, %s2313_s4, %s2314_s1  }
  0x87   :  { %s2319_s18 = smov [#allocation2]   ;;  %s2320_s6 = smov [#allocation7]  }
  0x88   :  { %s42_s21 = sshll.u32 %s2319_s18, 4  ;;  %s66_s7 = sshll.u32 %s2320_s6, 4  ;;  %s43_s21 = int_to_ptr.vmem [resolvable:$true] %s42_s21  ;;  %s2565_s7 = int_to_ptr.vmem [resolvable:$true] %s66_s7 }
  0x89   :  { %s2844_s24 = sld [smem:[#allocation32_spill]] }
  0x8f   :  { %s2119_s3 = scalar_lea.hbm %s2844_s24, 256 }
  0x90   :  { %p2120_p6 = scmp.ne.s32.totalorder %s2844_s24, %s2119_s3  ;;  %p2123_p7 = scmp.lt.u32.totalorder %s2119_s3, %s2844_s24 }
  0x92   :  { %p2125_p8 = pnand %p2123_p7, %p2120_p6 }
  0x94   :  { %2128 = shalt.err (!%p2125_p8)
}
  0x95   :  { %s2129_s14 = scalar_lea.vmem %s43_s21, 256  ;;  %p2134_p10 = scmp.lt.s32.totalorder %s43_s21, %s43_s21 }
  0x96   :  { %p2130_p9 = scmp.ne.s32.totalorder %s43_s21, %s2129_s14  ;;  %p2135_p11 = scmp.lt.s32.totalorder %s2129_s14, %s2129_s14 }
  0x98   :  { %p2136_p12 = por %p2135_p11, %p2134_p10 }
  0x9a   :  { %p2137_p13 = pnand %p2136_p12, %p2130_p9 }
  0x9c   :  { %2140 = shalt.err (!%p2137_p13)
}
  0x9d   :  { %48 = dma.hbm_to_vmem [thread:$0]  %s2844_s24, 256, %s43_s21, [#allocation3], %s2313_s4, %s2313_s4, %s2314_s1  }
  0x9e   :  { %s2845_s12 = sld [smem:[#allocation34_spill]] }
  0xa4   :  { %s2141_s8 = scalar_lea.hbm %s2845_s12, 256 }
  0xa5   :  { %p2142_p0 = scmp.ne.s32.totalorder %s2845_s12, %s2141_s8  ;;  %p2145_p1 = scmp.lt.u32.totalorder %s2141_s8, %s2845_s12 }
  0xa7   :  { %p2147_p2 = pnand %p2145_p1, %p2142_p0 }
  0xa9   :  { %2150 = shalt.err (!%p2147_p2)
}
  0xaa   :  { %s2151_s3 = scalar_lea.vmem %s2565_s7, 256  ;;  %p2156_p4 = scmp.lt.s32.totalorder %s2565_s7, %s2565_s7 }
  0xab   :  { %p2152_p3 = scmp.ne.s32.totalorder %s2565_s7, %s2151_s3  ;;  %p2157_p5 = scmp.lt.s32.totalorder %s2151_s3, %s2151_s3 }
  0xad   :  { %p2158_p6 = por %p2157_p5, %p2156_p4 }
  0xaf   :  { %p2159_p7 = pnand %p2158_p6, %p2152_p3 }
  0xb1   :  { %2162 = shalt.err (!%p2159_p7)
}
  0xb2   :  { %72 = dma.hbm_to_vmem [thread:$0]  %s2845_s12, 256, %s2565_s7, [#allocation6], %s2313_s4, %s2313_s4, %s2314_s1  }
  0xb3   :  { %s2321_s27 = smov [#allocation10]   ;;  %s2322_s25 = smov [#allocation13]  }
  0xb4   :  { %s92_s30 = sshll.u32 %s2321_s27, 4  ;;  %s118_s28 = sshll.u32 %s2322_s25, 4  ;;  %s93_s30 = int_to_ptr.vmem [resolvable:$true] %s92_s30  ;;  %s2602_s28 = int_to_ptr.vmem [resolvable:$true] %s118_s28 }
  0xb5   :  { %s2846_s26 = sld [smem:[#allocation37_spill]] }
  0xbb   :  { %s2163_s29 = scalar_lea.hbm %s2846_s26, 512 }
  0xbc   :  { %p2164_p8 = scmp.ne.s32.totalorder %s2846_s26, %s2163_s29  ;;  %p2167_p9 = scmp.lt.u32.totalorder %s2163_s29, %s2846_s26 }
  0xbe   :  { %p2169_p10 = pnand %p2167_p9, %p2164_p8 }
  0xc0   :  { %2172 = shalt.err (!%p2169_p10)
}
  0xc1   :  { %s2173_s7 = scalar_lea.vmem %s93_s30, 512  ;;  %p2178_p12 = scmp.lt.s32.totalorder %s93_s30, %s93_s30 }
  0xc2   :  { %p2174_p11 = scmp.ne.s32.totalorder %s93_s30, %s2173_s7  ;;  %p2179_p13 = scmp.lt.s32.totalorder %s2173_s7, %s2173_s7 }
  0xc4   :  { %p2180_p0 = por %p2179_p13, %p2178_p12 }
  0xc6   :  { %p2181_p1 = pnand %p2180_p0, %p2174_p11 }
  0xc8   :  { %2184 = shalt.err (!%p2181_p1)
}
  0xc9   :  { %98 = dma.hbm_to_vmem [thread:$0]  %s2846_s26, 512, %s93_s30, [#allocation9], %s2313_s4, %s2313_s4, %s2314_s1  }
  0xca   :  { %s2847_s21 = sld [smem:[#allocation40_spill]] }
  0xd0   :  { %s2185_s24 = scalar_lea.hbm %s2847_s21, 512 }
  0xd1   :  { %p2186_p2 = scmp.ne.s32.totalorder %s2847_s21, %s2185_s24  ;;  %p2189_p3 = scmp.lt.u32.totalorder %s2185_s24, %s2847_s21 }
  0xd3   :  { %p2191_p4 = pnand %p2189_p3, %p2186_p2 }
  0xd5   :  { %2194 = shalt.err (!%p2191_p4)
}
  0xd6   :  { %s2195_s29 = scalar_lea.vmem %s2602_s28, 512  ;;  %p2200_p6 = scmp.lt.s32.totalorder %s2602_s28, %s2602_s28 }
  0xd7   :  { %p2196_p5 = scmp.ne.s32.totalorder %s2602_s28, %s2195_s29  ;;  %p2201_p7 = scmp.lt.s32.totalorder %s2195_s29, %s2195_s29 }
  0xd9   :  { %p2202_p8 = por %p2201_p7, %p2200_p6 }
  0xdb   :  { %p2203_p9 = pnand %p2202_p8, %p2196_p5 }
  0xdd   :  { %2206 = shalt.err (!%p2203_p9)
}
  0xde   :  { %124 = dma.hbm_to_vmem [thread:$0]  %s2847_s21, 512, %s2602_s28, [#allocation12], %s2313_s4, %s2313_s4, %s2314_s1  }
  0xdf   :  { %s2323_s5 = smov [#allocation16]   ;;  %s2324_s18 = smov [#allocation19]  }
  0xe0   :  { %s144_s8 = sshll.u32 %s2323_s5, 4  ;;  %s168_s6 = sshll.u32 %s2324_s18, 4  ;;  %s145_s8 = int_to_ptr.vmem [resolvable:$true] %s144_s8  ;;  %s2639_s6 = int_to_ptr.vmem [resolvable:$true] %s168_s6 }
  0xe1   :  { %s2207_s10 = scalar_lea.hbm %s2807_s11, 512 }
  0xe2   :  { %p2208_p10 = scmp.ne.s32.totalorder %s2807_s11, %s2207_s10  ;;  %p2211_p11 = scmp.lt.u32.totalorder %s2207_s10, %s2807_s11 }
  0xe4   :  { %p2213_p12 = pnand %p2211_p11, %p2208_p10 }
  0xe6   :  { %2216 = shalt.err (!%p2213_p12)
}
  0xe7   :  { %s2217_s28 = scalar_lea.vmem %s145_s8, 512  ;;  %p2222_p0 = scmp.lt.s32.totalorder %s145_s8, %s145_s8 }
  0xe8   :  { %p2218_p13 = scmp.ne.s32.totalorder %s145_s8, %s2217_s28  ;;  %p2223_p1 = scmp.lt.s32.totalorder %s2217_s28, %s2217_s28 }
  0xea   :  { %p2224_p2 = por %p2223_p1, %p2222_p0 }
  0xec   :  { %p2225_p3 = pnand %p2224_p2, %p2218_p13 }
  0xee   :  { %2228 = shalt.err (!%p2225_p3)
}
  0xef   :  { %150 = dma.hbm_to_vmem [thread:$0]  %s2807_s11, 512, %s145_s8, [#allocation15], %s2313_s4, %s2313_s4, %s2314_s1  }
  0xf0   :  { %s2229_s29 = scalar_lea.hbm %s2809_s13, 512 }
  0xf1   :  { %p2230_p4 = scmp.ne.s32.totalorder %s2809_s13, %s2229_s29  ;;  %p2233_p5 = scmp.lt.u32.totalorder %s2229_s29, %s2809_s13 }
  0xf3   :  { %p2235_p6 = pnand %p2233_p5, %p2230_p4 }
  0xf5   :  { %2238 = shalt.err (!%p2235_p6)
}
  0xf6   :  { %s2239_s7 = scalar_lea.vmem %s2639_s6, 512  ;;  %p2244_p8 = scmp.lt.s32.totalorder %s2639_s6, %s2639_s6 }
  0xf7   :  { %p2240_p7 = scmp.ne.s32.totalorder %s2639_s6, %s2239_s7  ;;  %p2245_p9 = scmp.lt.s32.totalorder %s2239_s7, %s2239_s7 }
  0xf9   :  { %p2246_p10 = por %p2245_p9, %p2244_p8 }
  0xfb   :  { %p2247_p11 = pnand %p2246_p10, %p2240_p7 }
  0xfd   :  { %2250 = shalt.err (!%p2247_p11)
}
  0xfe   :  { %174 = dma.hbm_to_vmem [thread:$0]  %s2809_s13, 512, %s2639_s6, [#allocation18], %s2313_s4, %s2313_s4, %s2314_s1  }
  0xff   :  { %s2325_s12 = smov [#allocation22]   ;;  %s2251_s24 = scalar_lea.hbm %s2811_s15, 512 }
 0x100   :  { %s192_s10 = sshll.u32 %s2325_s12, 4  ;;  %p2252_p12 = scmp.ne.s32.totalorder %s2811_s15, %s2251_s24  ;;  %s193_s10 = int_to_ptr.vmem [resolvable:$true] %s192_s10 }
 0x101   :  { %p2255_p13 = scmp.lt.u32.totalorder %s2251_s24, %s2811_s15 }
 0x103   :  { %p2257_p0 = pnand %p2255_p13, %p2252_p12 }
 0x105   :  { %2260 = shalt.err (!%p2257_p0)
}
 0x106   :  { %s2261_s14 = scalar_lea.vmem %s193_s10, 512  ;;  %p2266_p2 = scmp.lt.s32.totalorder %s193_s10, %s193_s10 }
 0x107   :  { %p2262_p1 = scmp.ne.s32.totalorder %s193_s10, %s2261_s14  ;;  %p2267_p3 = scmp.lt.s32.totalorder %s2261_s14, %s2261_s14 }
 0x109   :  { %p2268_p4 = por %p2267_p3, %p2266_p2 }
 0x10b   :  { %p2269_p5 = pnand %p2268_p4, %p2262_p1 }
 0x10d   :  { %2272 = shalt.err (!%p2269_p5)
}
 0x10e   :  { %198 = dma.hbm_to_vmem [thread:$0]  %s2811_s15, 512, %s193_s10, [#allocation21], %s2313_s4, %s2313_s4, %s2314_s1  }
 0x10f   :  { %2295 = dma.done.wait [#allocation3], 256  }
 0x110   :  { %2296 = vsyncadd [#allocation3], 4294967040 }
 0x111   :  { %2297 = dma.done.wait [#allocation6], 512  }
 0x112   :  { %2298 = vsyncadd [#allocation6], 4294966784 }
 0x113   :  { %2299 = dma.done.wait [#allocation9], 1024  }
 0x114   :  { %2300 = vsyncadd [#allocation9], 4294966272 }
 0x115   :  { %2301 = dma.done.wait [#allocation12], 1024  }
 0x116   :  { %2302 = vsyncadd [#allocation12], 4294966272 }
 0x117   :  { %2303 = dma.done.wait [#allocation15], 1024  }
 0x118   :  { %2304 = vsyncadd [#allocation15], 4294966272 }
 0x119   :  { %2305 = dma.done.wait [#allocation18], 1024  }
 0x11a   :  { %2306 = vsyncadd [#allocation18], 4294966272 }
 0x11b   :  { %2307 = dma.done.wait [#allocation21], 1024  }
 0x11c   :  { %2308 = vsyncadd [#allocation21], 4294966272  ;;  %v256_v0 = vld [vmem:[#allocation8] sm:$0xff]  ;;  %v257_v1 = vld [vmem:[#allocation8 + $0x8] sm:$0xff]  ;;  %vm267_vm0 = vcmask 261120   ;;  %v2326_v14 = vmov 0.0  }
 0x11d   :  { %v349_v2 = vld [vmem:[#allocation10] sm:$0xff]  ;;  %v1843_v3 = vpack.c.bf16 %v257_v1, %v256_v0  ;;  %v350_v4 = vld [vmem:[#allocation10 + $0x8] sm:$0xff]  ;;  %v258_v5 = vld [vmem:[#allocation8 + $0x10] sm:$0xff]  ;;  %vm2327_vm1 = vmmov 0   ;;  %s2848_s29 = sld [smem:[#allocation36_spill]]  ;;  %s2849_s5 = sld [smem:[#allocation38_spill]] }
 0x11e   :  { %v259_v6 = vld [vmem:[#allocation8 + $0x18] sm:$0xff]  ;;  %v1851_v7 = vpack.c.bf16 %v350_v4, %v349_v2  ;;  %v2691_v9 = vld [vmem:[#allocation7] sm:$0xff]  ;;  %vm436_vm2 = vcmask 64512   ;;  %v510_v26 = vld [vmem:[#allocation5] sm:$0xff]  ;;  %s2328_s30 = smov [#allocation23]  }
 0x11f   :  { %v1847_v8 = vpack.c.bf16 %v259_v6, %v258_v5  ;;  %v351_v10 = vld [vmem:[#allocation10 + $0x10] sm:$0xff]  ;;  %v352_v11 = vld [vmem:[#allocation10 + $0x18] sm:$0xff]  ;;  %1844 = vmatprep.subr.bf16.mxu0 %v1843_v3  ;;  %1710 = vmatprep.mubr.msk.f32.mxu0 %vm267_vm0, %v2691_v9  ;;  %v660_v28 = vld [vmem:[#allocation5 + $0x8] sm:$0xff]  ;;  %s1570_s26 = sshll.u32 %s2328_s30, 4  ;;  %s1571_s26 = int_to_ptr.vmem [resolvable:$true] %s1570_s26 }
 0x120   :  { %v1855_v12 = vpack.c.bf16 %v352_v11, %v351_v10  ;;  %1846 = vmatpush3.bf16.msra.mxu0 %v1843_v3  ;;  %1852 = vmatprep.subr.bf16.mxu1 %v1851_v7  ;;  %v2697_v13 = vld [vmem:[#allocation7 + $0x8] sm:$0xff]  ;;  %v435_v24 = vld [vmem:[#allocation2] sm:$0xff]  ;;  %v756_v29 = vld [vmem:[#allocation14] sm:$0xff]  ;;  %p2278_p7 = scmp.lt.s32.totalorder %s1571_s26, %s1571_s26 }
 0x121   :  { %1848 = vmatprep.subr.bf16.mxu0 %v1847_v8  ;;  %1854 = vmatpush3.bf16.msra.mxu1 %v1851_v7  ;;  %v585_v21 = vld [vmem:[#allocation2 + $0x8] sm:$0xff]  ;;  %v757_v30 = vld [vmem:[#allocation14 + $0x8] sm:$0xff]  ;;  %v935_v32 = vld [vmem:[#allocation16] sm:$0xff] }
 0x122   :  { %1856 = vmatprep.subr.bf16.mxu1 %v1855_v12  ;;  %1721 = vmatprep.mubr.msk.f32.mxu1 %vm267_vm0, %v2691_v9  ;;  %v1859_v31 = vpack.c.bf16 %v757_v30, %v756_v29  ;;  %v936_v33 = vld [vmem:[#allocation16 + $0x8] sm:$0xff]  ;;  %v758_v35 = vld [vmem:[#allocation14 + $0x10] sm:$0xff]  ;;  %v759_v36 = vld [vmem:[#allocation14 + $0x18] sm:$0xff] }
 0x123   :  { %v1588_v15 = vld [vmem:[%s2848_s29] ss:$0 sm:$0xff]  ;;  %v1875_v34 = vpack.c.bf16 %v936_v33, %v935_v32  ;;  %v1863_v37 = vpack.c.bf16 %v759_v36, %v758_v35  ;;  %v938_v39 = vld [vmem:[#allocation16 + $0x18] sm:$0xff]  ;;  %v752_v41 = vld [vmem:[#allocation11] sm:$0xff]  ;;  %s2851_s29 = sld [smem:[#allocation41_spill]] }
 0x124   :  { %1850 = vmatpush3.bf16.msra.mxu0 %v1847_v8  ;;  %v1591_v17 = vld [vmem:[%s2849_s5] ss:$0 sm:$0xff]  ;;  %v753_v42 = vld [vmem:[#allocation11 + $0x8] sm:$0xff]  ;;  %v931_v44 = vld [vmem:[#allocation13] sm:$0xff]  ;;  %s2273_s5 = scalar_lea.vmem %s1571_s26, 256 }
 0x125   :  { %1858 = vmatpush3.bf16.msra.mxu1 %v1855_v12  ;;  %1734 = vmatprep.subr.mxu0 %v2326_v14  ;;  %v937_v38 = vld [vmem:[#allocation16 + $0x10] sm:$0xff]  ;;  %v1867_v43 = vpack.c.bf16 %v753_v42, %v752_v41  ;;  %v932_v45 = vld [vmem:[#allocation13 + $0x8] sm:$0xff]  ;;  %v755_v57 = vld [vmem:[#allocation11 + $0x18] sm:$0xff]  ;;  %p2274_p6 = scmp.ne.s32.totalorder %s1571_s26, %s2273_s5  ;;  %p2279_p8 = scmp.lt.s32.totalorder %s2273_s5, %s2273_s5 }
 0x126   :  { %1724 = vmatprep.subr.mxu1 %v2326_v14  ;;  %v1879_v40 = vpack.c.bf16 %v938_v39, %v937_v38  ;;  %v1883_v46 = vpack.c.bf16 %v932_v45, %v931_v44  ;;  %v1599_v51 = vld [vmem:[%s2819_s23] ss:$0 sm:$0xff]  ;;  %v934_v59 = vld [vmem:[#allocation13 + $0x18] sm:$0xff]  ;;  %v1102_v2 = vld [vmem:[#allocation17] sm:$0xff] }
 0x127   :  { %1711 = vmatmul.mubr.msk.f32.vlgmr.msra.gmra.mrb[0].mxu0 %vm267_vm0, %v2697_v13  ;;  %v1598_v55 = vld [vmem:[%s2818_s22] ss:$0 sm:$0xff]  ;;  %v1103_v3 = vld [vmem:[#allocation17 + $0x8] sm:$0xff]  ;;  %v1351_v4 = vld [vmem:[#allocation20] sm:$0xff]  ;;  %p2280_p9 = por %p2279_p8, %p2278_p7 }
 0x128   :  { %1722 = vmatmul.mubr.msk.f32.vlgmr.msra.gmra.mrb[0].mxu1 %vm267_vm0, %v2697_v13  ;;  %1736 = vmatprep.mubr.msk.f32.mxu0 %vm2327_vm1, %v2326_v14  ;;  %v754_v56 = vld [vmem:[#allocation11 + $0x10] sm:$0xff]  ;;  %v1352_v5 = vld [vmem:[#allocation20 + $0x8] sm:$0xff]  ;;  %v1891_v6 = vpack.c.bf16 %v1103_v3, %v1102_v2  ;;  %v1105_v11 = vld [vmem:[#allocation17 + $0x18] sm:$0xff] }
 0x129   :  { %1726 = vmatprep.mubr.msk.f32.mxu1 %vm2327_vm1, %v2326_v14  ;;  %v933_v58 = vld [vmem:[#allocation13 + $0x10] sm:$0xff]  ;;  %v1871_v0 = vpack.c.bf16 %v755_v57, %v754_v56  ;;  %v1915_v7 = vpack.c.bf16 %v1352_v5, %v1351_v4  ;;  %v1266_v29 = vld [vmem:[#allocation19 + $0x8] sm:$0xff]  ;;  %v1268_v33 = vld [vmem:[#allocation19 + $0x18] sm:$0xff]  ;;  %p2281_p10 = pnand %p2280_p9, %p2274_p6 }
 0x12a   :  { %v1887_v1 = vpack.c.bf16 %v934_v59, %v933_v58  ;;  %v1104_v8 = vld [vmem:[#allocation17 + $0x10] sm:$0xff] }
 0x12b   :  { %v1353_v12 = vld [vmem:[#allocation20 + $0x10] sm:$0xff] }
 0x12c   :  { %v1267_v32 = vld [vmem:[#allocation19 + $0x10] sm:$0xff] }
 0x12d   :  { %v1604_v41 = vld [vmem:[%s2812_s16] ss:$0 sm:$0xff] }
 0x12e   :  { %v1614_v2 = vld [vmem:[%s2851_s29] ss:$0 sm:$0xff] }
 0x1fa   :  { %v1712_v16 = vpop.f32.mrb[0].mxu0 }
 0x1fb   :  { %v346_v18 = vadd.f32 %v1712_v16, %v1588_v15  ;;  %v340_v19 = vpop.f32.mrb[1].mxu0  ;;  %v1723_v20 = vpop.f32.mrb[0].mxu1 }
 0x1fc   :  { %v341_v22 = vadd.f32 %v1588_v15, %v340_v19  ;;  %v426_v23 = vpop.f32.mrb[1].mxu1  ;;  %v432_v27 = vadd.f32 %v1723_v20, %v1591_v17  ;;  %v1895_v15 = vpack.c.bf16 %v1105_v11, %v1104_v8  ;;  %v1437_v19 = vld [vmem:[#allocation22] sm:$0xff]  ;;  %v1438_v20 = vld [vmem:[#allocation22 + $0x8] sm:$0xff] }
 0x1fd   :  { %1735 = vmatpush3.msra.mxu0 %v346_v18  ;;  %v427_v25 = vadd.f32 %v1591_v17, %v426_v23  ;;  %v1098_v17 = vld [vmem:[%s2805_s9] sm:$0xff]  ;;  %v1099_v18 = vld [vmem:[%s2805_s9 + $0x8] sm:$0xff]  ;;  %v1101_v23 = vld [vmem:[%s2805_s9 + $0x18] sm:$0xff] }
 0x1fe   :  { %1725 = vmatpush3.msra.mxu1 %v341_v22  ;;  %1737 = vmatmul.mubr.msk.f32.vlgmr.msra.gmra.mrb[2].mxu0 %vm436_vm2, %v585_v21  ;;  %v1899_v21 = vpack.c.bf16 %v1099_v18, %v1098_v17  ;;  %v1100_v22 = vld [vmem:[%s2805_s9 + $0x10] sm:$0xff] }
 0x1ff   :  { %1727 = vmatmul.mubr.msk.f32.vlgmr.msra.gmra.mrb[2].mxu1 %vm436_vm2, %v435_v24  ;;  %1729 = vmatprep.subr.mxu1 %v2326_v14  ;;  %v1923_v24 = vpack.c.bf16 %v1438_v20, %v1437_v19 }
 0x200   :  { %1730 = vmatpush3.msra.mxu1 %v427_v25  ;;  %1731 = vmatprep.mubr.msk.f32.mxu1 %vm2327_vm1, %v2326_v14  ;;  %v1439_v25 = vld [vmem:[#allocation22 + $0x10] sm:$0xff] }
 0x201   :  { %1739 = vmatprep.subr.mxu1 %v2326_v14  ;;  %1860 = vmatprep.subr.bf16.mxu0 %v1859_v31 }
 0x202   :  { %1862 = vmatpush3.bf16.msra.mxu0 %v1859_v31 }
 0x203   :  { %1732 = vmatmul.mubr.msk.f32.vlgmr.msra.gmra.mrb[4].mxu1 %vm436_vm2, %v510_v26  ;;  %1864 = vmatprep.subr.bf16.mxu0 %v1863_v37  ;;  %v1440_v26 = vld [vmem:[#allocation22 + $0x18] sm:$0xff] }
 0x204   :  { %1740 = vmatpush3.msra.mxu1 %v432_v27  ;;  %1741 = vmatprep.mubr.msk.f32.mxu1 %vm2327_vm1, %v2326_v14  ;;  %v1354_v14 = vld [vmem:[#allocation20 + $0x18] sm:$0xff]  ;;  %v1903_v27 = vpack.c.bf16 %v1101_v23, %v1100_v22  ;;  %v1927_v30 = vpack.c.bf16 %v1440_v26, %v1439_v25 }
 0x205   :  { %1876 = vmatprep.subr.bf16.mxu1 %v1875_v34  ;;  %v1919_v16 = vpack.c.bf16 %v1354_v14, %v1353_v12 }
 0x206   :  { %1866 = vmatpush3.bf16.msra.mxu0 %v1863_v37 }
 0x207   :  { %1742 = vmatmul.mubr.msk.f32.vlgmr.msra.gmra.mrb[6].mxu1 %vm436_vm2, %v660_v28  ;;  %1868 = vmatprep.subr.bf16.mxu0 %v1867_v43  ;;  %v1265_v28 = vld [vmem:[#allocation19] sm:$0xff] }
 0x208   :  { %1878 = vmatpush3.bf16.msra.mxu1 %v1875_v34  ;;  %v1907_v31 = vpack.c.bf16 %v1266_v29, %v1265_v28  ;;  %v1911_v34 = vpack.c.bf16 %v1268_v33, %v1267_v32 }
 0x209   :  { %1880 = vmatprep.subr.bf16.mxu1 %v1879_v40 }
 0x20c   :  { %1882 = vmatpush3.bf16.msra.mxu1 %v1879_v40 }
 0x20d   :  { %1884 = vmatprep.subr.bf16.mxu1 %v1883_v46 }
 0x2d1   :  { %v655_v47 = vpop.f32.mrb[2].mxu0 }
 0x2d2   :  { %v506_v48 = vpop.f32.mrb[2].mxu1  ;;  %v1738_v49 = vpop.f32.mrb[3].mxu0  ;;  %v742_v10 = vadd.f32 %v1598_v55, %v655_v47 }
 0x2d3   :  { %v1728_v50 = vpop.f32.mrb[3].mxu1  ;;  %v741_v63 = vadd.f32 %v1598_v55, %v506_v48  ;;  %v1609_v48 = vld [vmem:[%s2813_s17] ss:$0 sm:$0xff] }
 0x2d6   :  { %v580_v52 = vpop.f32.mrb[4].mxu1 }
 0x2d7   :  { %v750_v53 = vadd.f32 %v1599_v51, %v580_v52  ;;  %v1733_v54 = vpop.f32.mrb[5].mxu1 }
 0x2d9   :  { %1752 = vmatprep.mubr.msk.f32.mxu0 %vm267_vm0, %v750_v53  ;;  %1774 = vmatprep.mubr.msk.f32.mxu1 %vm267_vm0, %v750_v53 }
 0x2da   :  { %v730_v60 = vpop.f32.mrb[6].mxu1 }
 0x2db   :  { %v751_v61 = vadd.f32 %v1599_v51, %v730_v60  ;;  %v1743_v62 = vpop.f32.mrb[7].mxu1 }
 0x2dd   :  { %1753 = vmatmul.mubr.msk.f32.vlgmr.msra.gmra.mrb[4].mxu0 %vm267_vm0, %v751_v61  ;;  %1775 = vmatmul.mubr.msk.f32.vlgmr.msra.gmra.mrb[8].mxu1 %vm267_vm0, %v751_v61 }
 0x2de   :  { %1870 = vmatpush3.bf16.msra.mxu0 %v1867_v43  ;;  %1763 = vmatprep.mubr.msk.f32.mxu0 %vm267_vm0, %v741_v63  ;;  %v1615_v43 = vld [vmem:[%s2815_s19] ss:$0 sm:$0xff]  ;;  %s2850_s19 = sld [smem:[#allocation42_spill]] }
 0x2df   :  { %1886 = vmatpush3.bf16.msra.mxu1 %v1883_v46  ;;  %1785 = vmatprep.mubr.msk.f32.mxu1 %vm267_vm0, %v741_v63 }
 0x2e0   :  { %1872 = vmatprep.subr.bf16.mxu0 %v1871_v0  ;;  %1888 = vmatprep.subr.bf16.mxu1 %v1887_v1 }
 0x2e2   :  { %1874 = vmatpush3.bf16.msra.mxu0 %v1871_v0 }
 0x2e3   :  { %1890 = vmatpush3.bf16.msra.mxu1 %v1887_v1  ;;  %1892 = vmatprep.subr.bf16.mxu0 %v1891_v6 }
 0x2e4   :  { %1916 = vmatprep.subr.bf16.mxu1 %v1915_v7 }
 0x2e5   :  { %1764 = vmatmul.mubr.msk.f32.vlgmr.msra.gmra.mrb[4].mxu0 %vm267_vm0, %v742_v10 }
 0x2e6   :  { %1786 = vmatmul.mubr.msk.f32.vlgmr.msra.gmra.mrb[8].mxu1 %vm267_vm0, %v742_v10  ;;  %1894 = vmatpush3.bf16.msra.mxu0 %v1891_v6 }
 0x2e7   :  { %1796 = vmatprep.mubr.msk.f32.mxu0 %vm267_vm0, %v750_v53  ;;  %1918 = vmatpush3.bf16.msra.mxu1 %v1915_v7  ;;  %v1618_v53 = vld [vmem:[%s2816_s20] ss:$0 sm:$0xff] }
 0x2e8   :  { %1896 = vmatprep.subr.bf16.mxu0 %v1895_v15  ;;  %1920 = vmatprep.subr.bf16.mxu1 %v1919_v16 }
 0x2e9   :  { %1829 = vmatprep.mubr.msk.f32.mxu1 %vm267_vm0, %v2691_v9 }
 0x2ea   :  { %1898 = vmatpush3.bf16.msra.mxu0 %v1895_v15 }
 0x2eb   :  { %1922 = vmatpush3.bf16.msra.mxu1 %v1919_v16  ;;  %1900 = vmatprep.subr.bf16.mxu0 %v1899_v21 }
 0x2ec   :  { %1924 = vmatprep.subr.bf16.mxu1 %v1923_v24 }
 0x2ed   :  { %1797 = vmatmul.mubr.msk.f32.vlgmr.msra.gmra.mrb[6].mxu0 %vm267_vm0, %v751_v61 }
 0x2ee   :  { %1902 = vmatpush3.bf16.msra.mxu0 %v1899_v21  ;;  %1807 = vmatprep.mubr.msk.f32.mxu0 %vm267_vm0, %v741_v63  ;;  %v1621_v63 = vld [vmem:[%s2850_s19] ss:$0 sm:$0xff] }
 0x2ef   :  { %1830 = vmatmul.mubr.msk.f32.vlgmr.msra.gmra.mrb[8].mxu1 %vm267_vm0, %v2697_v13  ;;  %1904 = vmatprep.subr.bf16.mxu0 %v1903_v27 }
 0x2f0   :  { %1926 = vmatpush3.bf16.msra.mxu1 %v1923_v24  ;;  %1840 = vmatprep.mubr.msk.f32.mxu1 %vm267_vm0, %v2691_v9 }
 0x2f1   :  { %1928 = vmatprep.subr.bf16.mxu1 %v1927_v30 }
 0x2f2   :  { %1906 = vmatpush3.bf16.msra.mxu0 %v1903_v27 }
 0x2f3   :  { %1908 = vmatprep.subr.bf16.mxu0 %v1907_v31 }
 0x2f4   :  { %1930 = vmatpush3.bf16.msra.mxu1 %v1927_v30 }
 0x2f5   :  { %1808 = vmatmul.mubr.msk.f32.vlgmr.msra.gmra.mrb[6].mxu0 %vm267_vm0, %v742_v10 }
 0x2f6   :  { %1910 = vmatpush3.bf16.msra.mxu0 %v1907_v31  ;;  %1818 = vmatprep.mubr.msk.f32.mxu0 %vm267_vm0, %v2691_v9 }
 0x2f7   :  { %1912 = vmatprep.subr.bf16.mxu0 %v1911_v34  ;;  %1841 = vmatmul.mubr.msk.f32.vlgmr.msra.gmra.mrb[10].mxu1 %vm267_vm0, %v2697_v13 }
 0x2fa   :  { %1914 = vmatpush3.bf16.msra.mxu0 %v1911_v34 }
 0x2fd   :  { %1819 = vmatmul.mubr.msk.f32.vlgmr.msra.gmra.mrb[4].mxu0 %vm267_vm0, %v2697_v13 }
 0x3c2   :  { %v1831_v35 = vpop.f32.mrb[8].mxu1 }
 0x3c3   :  { %v1428_v36 = vpop.f32.mrb[9].mxu1  ;;  %v1935_v52 = vadd.f32 %v1831_v35, %v1609_v48 }
 0x3c4   :  { %v1937_v54 = vadd.f32 %v1609_v48, %v1428_v36 }
 0x3c5   :  { %v1936_v55 = vadd.f32 %v1935_v52, %v1618_v53 }
 0x3c6   :  { %v1938_v56 = vadd.f32 %v1937_v54, %v1618_v53 }
 0x3c7   :  { %v1627_v57 = vmul.f32 -1.442695, %v1936_v55 }
 0x3c8   :  { %v1809_v37 = vpop.f32.mrb[6].mxu0  ;;  %v1626_v58 = vmul.f32 -1.442695, %v1938_v56 }
 0x3c9   :  { %v1247_v38 = vpop.f32.mrb[7].mxu0  ;;  %v1264_v7 = vadd.f32 %v1809_v37, %v1614_v2 }
 0x3ca   :  { %v1842_v39 = vpop.f32.mrb[10].mxu1  ;;  %v1263_v10 = vadd.f32 %v1614_v2, %v1247_v38 }
 0x3cb   :  { %v1514_v40 = vpop.f32.mrb[11].mxu1  ;;  %v1520_v0 = vadd.f32 %v1842_v39, %v1621_v63 }
 0x3cc   :  { %v1515_v3 = vadd.f32 %v1621_v63, %v1514_v40 }
 0x3d0   :  { %v1820_v42 = vpop.f32.mrb[4].mxu0 }
 0x3d1   :  { %v1931_v44 = vadd.f32 %v1820_v42, %v1604_v41  ;;  %v1342_v45 = vpop.f32.mrb[5].mxu0 }
 0x3d2   :  { %v1933_v46 = vadd.f32 %v1604_v41, %v1342_v45 }
 0x3d3   :  { %v1932_v47 = vadd.f32 %v1931_v44, %v1615_v43 }
 0x3d4   :  { %v1934_v49 = vadd.f32 %v1933_v46, %v1615_v43 }
 0x3d5   :  { %v1625_v50 = vmul.f32 -1.442695, %v1932_v47 }
 0x3d6   :  { %v1624_v51 = vmul.f32 -1.442695, %v1934_v49 }
 0x3d7   :  { %1967 = vpow2.f32 %v1625_v50 }
 0x3d8   :  { %1969 = vpow2.f32 %v1624_v51 }
 0x3d9   :  { %1971 = vpow2.f32 %v1627_v57 }
 0x3da   :  { %1973 = vpow2.f32 %v1626_v58 }
 0x3e1   :  { %v1968_v59 = vpop.eup %1967 }
 0x3e2   :  { %v1970_v60 = vpop.eup %1969  ;;  %v1532_v61 = vadd.f32 1.0, %v1968_v59 }
 0x3e3   :  { %v1531_v62 = vadd.f32 1.0, %v1970_v60  ;;  %v1972_v1 = vpop.eup %1971 }
 0x3e4   :  { %1975 = vrcp.f32 %v1532_v61  ;;  %v1974_v4 = vpop.eup %1973  ;;  %v1546_v12 = vadd.f32 1.0, %v1972_v1 }
 0x3e5   :  { %1977 = vrcp.f32 %v1531_v62  ;;  %v1545_v15 = vadd.f32 1.0, %v1974_v4 }
 0x3ee   :  { %v1976_v5 = vpop.eup %1975 }
 0x3ef   :  { %v1978_v6 = vpop.eup %1977  ;;  %v1552_v8 = vmul.f32 %v1976_v5, %v1520_v0 }
 0x3f0   :  { %v1551_v11 = vmul.f32 %v1978_v6, %v1515_v3 }
 0x3f1   :  { %v1554_v14 = vadd.f32 %v1552_v8, %v1264_v7 }
 0x3f2   :  { %v1553_v16 = vadd.f32 %v1551_v11, %v1263_v10 }
 0x3f3   :  { %1979 = vtanh.f32 %v1554_v14 }
 0x3f4   :  { %1981 = vtanh.f32 %v1553_v16 }
 0x3f5   :  { %1983 = vrcp.f32 %v1546_v12 }
 0x3f6   :  { %1985 = vrcp.f32 %v1545_v15 }
 0x3fd   :  { %v1980_v17 = vpop.eup %1979 }
 0x3fe   :  { %v1982_v18 = vpop.eup %1981  ;;  %v1558_v19 = vsub.f32 %v2697_v13, %v1980_v17 }
 0x3ff   :  { %v1984_v20 = vpop.eup %1983  ;;  %v1557_v21 = vsub.f32 %v2691_v9, %v1982_v18 }
 0x400   :  { %v1986_v22 = vpop.eup %1985  ;;  %v1560_v23 = vmul.f32 %v1984_v20, %v1558_v19 }
 0x401   :  { %v1559_v24 = vmul.f32 %v1986_v22, %v1557_v21 }
 0x402   :  { %v1562_v25 = vadd.f32 %v1980_v17, %v1560_v23 }
 0x403   :  { %v1561_v26 = vadd.f32 %v1982_v18, %v1559_v24 }
 0x404   :  { %1564 = vst.msk [vmem:[#allocation23 + $0x8] sm:$0xff] %vm267_vm0, %v1562_v25 }
 0x405   :  { %1563 = vst.msk [vmem:[#allocation23] sm:$0xff] %vm267_vm0, %v1561_v26 }
 0x406   :  { %2284 = shalt.err (!%p2281_p10)
}
 0x407   :  { %s2852_s11 = sld [smem:[#allocation43_spill]] }
 0x40d   :  { %s2285_s8 = scalar_lea.hbm %s2852_s11, 256 }
 0x40e   :  { %p2286_p11 = scmp.ne.s32.totalorder %s2852_s11, %s2285_s8  ;;  %p2289_p12 = scmp.lt.u32.totalorder %s2285_s8, %s2852_s11 }
 0x410   :  { %p2291_p13 = pnand %p2289_p12, %p2286_p11 }
 0x412   :  { %2294 = shalt.err (!%p2291_p13)
}
 0x413   :  { %1576 = dma.vmem_to_hbm [thread:$0]  %s1571_s26, 256, %s2852_s11, [#allocation4], %s2313_s4, %s2313_s4, %s2314_s1  }
 0x414   :  { %2309 = dma.done.wait [#allocation4], 256  }
 0x415   :  { %2310 = vsyncadd [#allocation4], 4294967040 }
 0x416   :  { %1580 = vsyncpa [#allocation3], 1 }
 0x417   :  { %1581 = vsyncpa [#allocation6], 1 }
 0x418   :  { %1582 = vsyncpa [#allocation9], 1 }
 0x419   :  { %1583 = vsyncpa [#allocation12], 1 }
 0x41a   :  { %1584 = vsyncpa [#allocation15], 1 }
 0x41b   :  { %1585 = vsyncpa [#allocation18], 1 }
 0x41c   :  { %1586 = vsyncpa [#allocation21], 1 }
 0x41d   :  { %1587 = vsyncpa [#allocation4], 1 }

</bundles_post_ra>
